<compile_context>
chip_gen: v5e
topology: v5e:2x2
jax: 0.10.0
libtpu: 0.0.40
codegen_flags: <defaults>
</compile_context>

<pallas_src>
import functools

import numpy as np
import jax
import jax.numpy as jnp
from jax import lax
from jax.experimental import pallas as pl
from jax.experimental.pallas import tpu as pltpu

NUM_POS = 2
NUM_NEG = 2
LANES = 128


# ----------------------------------------------------------------------------
# Faithful numpy port of the module's mask precompute (used for verification).
# ----------------------------------------------------------------------------
def precompute_pos_neg_mask(effective_batch_size: int, world_size: int = 1, rank: int = 0):
    total_images = effective_batch_size * NUM_NEG
    batch_size = effective_batch_size // world_size
    orig_images = batch_size // NUM_POS
    pos_mask = np.zeros((batch_size * NUM_NEG, total_images), dtype=np.float32)
    neg_mask = np.zeros((batch_size * NUM_NEG, total_images), dtype=np.float32)
    all_indices = np.arange(total_images)
    pairs = orig_images * np.arange(NUM_POS)
    all_pos_members = []
    for _rank in range(world_size):
        all_pos_members += list(_rank * (batch_size * 2) + np.arange(batch_size))
    all_indices_pos_removed = np.delete(all_indices, all_pos_members)
    orig_members = np.arange(orig_images)
    for anchor in np.arange(NUM_POS):
        for img_idx in range(orig_images):
            delete_inds = batch_size * rank + img_idx + pairs
            neg_inds = np.delete(all_indices_pos_removed, delete_inds)
            neg_mask[anchor * orig_images + img_idx, neg_inds] = 1.0
        for pos in np.delete(np.arange(NUM_POS), anchor):
            pos_inds = batch_size * NUM_NEG * rank + pos * orig_images + orig_members
            pos_mask[np.arange(anchor * orig_images, (anchor + 1) * orig_images), pos_inds] = 1.0
    return pos_mask, neg_mask


# ----------------------------------------------------------------------------
# Structural (mask-free) description of the same masks.
# ----------------------------------------------------------------------------
def build_neg_base(effective_batch_size: int, world_size: int) -> np.ndarray:
    """Column vector (total_images,): 1.0 where the column belongs to the negative
    base set (second half of every rank's 2*batch_size slab), else 0.0."""
    total = effective_batch_size * NUM_NEG
    bs = effective_batch_size // world_size
    base = np.zeros((total,), dtype=np.float32)
    for r in range(world_size):
        base[r * 2 * bs + bs:(r + 1) * 2 * bs] = 1.0
    return base


def masks_from_structure(effective_batch_size: int, world_size: int, rank: int):
    """Rebuild dense masks from the structural form (for verification only)."""
    total = effective_batch_size * NUM_NEG
    bs = effective_batch_size // world_size
    orig = bs // 2
    rank_off = 2 * bs * rank
    base = build_neg_base(effective_batch_size, world_size)
    pos = np.zeros((2 * bs, total), dtype=np.float32)
    neg = np.zeros((2 * bs, total), dtype=np.float32)
    for r in range(bs):                       # only the first bs rows are ever non-zero
        a1 = r >= orig
        img = r - orig if a1 else r
        pos_col = rank_off + (img if a1 else r + orig)
        e1 = rank_off + bs + img
        e2 = e1 + orig
        pos[r, pos_col] = 1.0
        neg[r, :] = base
        neg[r, e1] = 0.0
        neg[r, e2] = 0.0
    return pos, neg


# ----------------------------------------------------------------------------
# Tiling helpers.
# ----------------------------------------------------------------------------
def _round_up(x: int, m: int) -> int:
    return (x + m - 1) // m * m


def _pick_row_tile(half: int, preferred: int) -> int:
    """Row (sublane) tile over the first B/2 anchor rows.  Clamped so that at
    least two row tiles exist (keeps both v7x TensorCores busy)."""
    assert half % 8 == 0, "per-rank batch_size (= local_batch // 2) must be a multiple of 8"
    cap = half
    if half >= 16:
        cap = (half // 2) - ((half // 2) % 8)
    t = min(preferred, cap)
    t -= t % 8
    t = max(t, 8)
    while half % t:
        t -= 8
    return t


def _pick_col_tile(cols_padded: int, d: int, tm: int, itemsize: int, budget_bytes: int) -> int:
    """Largest column tile (multiple of 128, divides padded B) whose VMEM working
    set fits the budget.  Budget default is sized for v7x (64 MiB/TC); raise it on
    v5e/v6e (128 MiB) for fewer grid steps."""
    assert cols_padded % LANES == 0

    def footprint(t):
        rhs = 2 * d * t * itemsize           # double-buffered (D, tk) RHS tile
        lhs = 2 * tm * d * itemsize          # double-buffered (tm, D) LHS tile
        work = 4 * tm * t * 4                # sim + weight/select transients (f32)
        fixed = 4 * tm * LANES * 4 + 4 * LANES  # accumulators + out + neg_base row
        return rhs + lhs + work + fixed

    best = LANES
    t = LANES
    while t <= cols_padded:
        if cols_padded % t == 0 and footprint(t) <= budget_bytes:
            best = t
        t += LANES
    return best


def _lane_group_sum(x):
    """(tm, tk) f32 -> (tm, 128) per-lane-group partial sums (tk % 128 == 0).
    Defers the cross-lane XLU reduce to the per-row-tile finalize."""
    tk = x.shape[1]
    acc = x[:, 0:LANES]
    for g in range(1, tk // LANES):
        acc = acc + x[:, g * LANES:(g + 1) * LANES]
    return acc


# ----------------------------------------------------------------------------
# Kernel.
# ----------------------------------------------------------------------------
def _neg_mining_infonce_kernel(lhs_ref, rhs_ref, negb_ref, out_ref, pos_acc, neg_acc,
                               *, bs, orig, rank_off):
    """Grid = (row_tiles, col_tiles); columns are the reduction axis.

    lhs_ref : (tm, D)   anchor rows, pre-scaled by 1/T (bf16 or f32)
    rhs_ref : (D, tk)   gathered embeddings, pre-transposed (MXU-native K,N)
    negb_ref: (1, tk)   f32 column membership of the negative base set
    out_ref : (tm, 128) f32, log(pos / (pos + neg)) broadcast over lanes
    """
    i = pl.program_id(0)
    k = pl.program_id(1)
    tm = lhs_ref.shape[0]
    tk = rhs_ref.shape[1]

    @pl.when(k == 0)
    def _init():
        pos_acc[...] = jnp.zeros_like(pos_acc)
        neg_acc[...] = jnp.zeros_like(neg_acc)

    # MXU matmul (bf16 operands by default), f32 accumulate, then exp on EUP.
    logits = jnp.dot(lhs_ref[...], rhs_ref[...], preferred_element_type=jnp.float32)
    sim = jnp.exp(logits)                                        # (tm, tk) f32

    # Rebuild the pos / neg weights in-register (no dense masks streamed).
    rows = i * tm + lax.broadcasted_iota(jnp.int32, (tm, 1), 0)  # global anchor row
    is_a1 = rows >= orig
    img = jnp.where(is_a1, rows - orig, rows)
    pos_col = rank_off + jnp.where(is_a1, rows - orig, rows + orig)
    excl1 = rank_off + bs + img
    excl2 = excl1 + orig

    cols = k * tk + lax.broadcasted_iota(jnp.int32, (tm, tk), 1)  # global column

    pos_vals = jnp.where(cols == pos_col, sim, 0.0)
    # excluded columns always lie inside the negative base set, so this is exact.
    neg_vals = sim * negb_ref[...] - jnp.where((cols == excl1) | (cols == excl2), sim, 0.0)

    pos_acc[...] += _lane_group_sum(pos_vals)
    neg_acc[...] += _lane_group_sum(neg_vals)

    @pl.when(k == pl.num_programs(1) - 1)
    def _finalize():
        pos = jnp.sum(pos_acc[...], axis=1, keepdims=True)       # one XLU reduce / row tile
        neg = jnp.sum(neg_acc[...], axis=1, keepdims=True)
        log_ratio = jnp.log(pos / (pos + neg))                   # (tm, 1)
        out_ref[...] = jnp.broadcast_to(log_ratio, out_ref.shape)  # lane-dense store


# ----------------------------------------------------------------------------
# Criterion factory (mirrors the module: __init__ precomputes, forward takes emb).
# ----------------------------------------------------------------------------
def make_neg_mining_info_nce_criterion(effective_batch_size: int, embedding_dim: int,
                                       temperature: float, world_size: int = 1, rank: int = 0,
                                       *, compute_dtype=jnp.bfloat16, row_tile: int = 256,
                                       col_tile_vmem_budget_bytes: int = 24 * 1024 * 1024,
                                       vmem_limit_bytes: int = 48 * 1024 * 1024):
    """Returns loss_fn(embedding, embeddings_buffer=None) implementing
    NegativeMiningInfoNCECriterion.forward.

    compute_dtype=jnp.bfloat16 (default) uses the fast bf16 MXU path (~1e-3 rel.
    precision budget); jnp.float32 reproduces the PyTorch forward to fp32 rounding.
    Defaults for the VMEM budget / limit are sized for v7x (64 MiB VMEM/TC); on
    v5e/v6e they can be raised toward ~96 MiB for larger column tiles.
    """
    total_images = effective_batch_size * NUM_NEG
    bs = effective_batch_size // world_size        # per-rank local batch_size
    orig = bs // NUM_POS
    half = bs                                      # rows used by the loss = local_batch // 2
    inv_t = float(1.0 / temperature)
    itemsize = jnp.dtype(compute_dtype).itemsize

    b_pad = _round_up(total_images, LANES)
    tm = _pick_row_tile(half, row_tile)
    tk = _pick_col_tile(b_pad, embedding_dim, tm, itemsize, col_tile_vmem_budget_bytes)
    grid = (half // tm, b_pad // tk)

    # Tiny per-column negative-base vector (the only "mask" ever streamed).
    negb_np = np.zeros((1, b_pad), dtype=np.float32)
    negb_np[0, :total_images] = build_neg_base(effective_batch_size, world_size)
    neg_base = jnp.asarray(negb_np)

    kernel = functools.partial(_neg_mining_infonce_kernel,
                               bs=bs, orig=orig, rank_off=2 * bs * rank)

    grid_spec = pltpu.PrefetchScalarGridSpec(
        num_scalar_prefetch=0,
        grid=grid,
        in_specs=[
            pl.BlockSpec((tm, embedding_dim), lambda i, k: (i, 0)),   # scaled anchor rows
            pl.BlockSpec((embedding_dim, tk), lambda i, k: (0, k)),   # emb^T (K, N) tiles
            pl.BlockSpec((1, tk), lambda i, k: (0, k)),               # neg-base columns
        ],
        out_specs=pl.BlockSpec((tm, LANES), lambda i, k: (i, 0)),
        scratch_shapes=[
            pltpu.VMEM((tm, LANES), jnp.float32),                     # pos lane-partials
            pltpu.VMEM((tm, LANES), jnp.float32),                     # neg lane-partials
        ],
    )

    call = pl.pallas_call(
        kernel,
        out_shape=jax.ShapeDtypeStruct((half, LANES), jnp.float32),
        grid_spec=grid_spec,
        compiler_params=pltpu.CompilerParams(
            dimension_semantics=("parallel", "arbitrary"),
            vmem_limit_bytes=vmem_limit_bytes,
        ),
    )

    def loss_fn(embedding, embeddings_buffer=None):
        if embeddings_buffer is None:
            # TODO(synk): cross-device all-gather (gather_embeddings); single-process fallback.
            embeddings_buffer = embedding
        b_local, d = embedding.shape
        assert d == embedding_dim
        assert b_local == 2 * bs, "batch size must equal pos_mask rows"
        assert embeddings_buffer.shape == (total_images, embedding_dim)

        # Hoisted out of the kernel's reduction loop: 1/T fold, cast, RHS transpose, padding.
        lhs = (embedding[:half].astype(jnp.float32) * inv_t).astype(compute_dtype)
        rhs = embeddings_buffer.T.astype(compute_dtype)
        if b_pad != total_images:
            rhs = jnp.pad(rhs, ((0, 0), (0, b_pad - total_images)))

        log_ratio_rows = call(lhs, rhs, neg_base)
        return -jnp.mean(log_ratio_rows[:, 0])

    return loss_fn


# ----------------------------------------------------------------------------
# Plain-JAX port of the PyTorch forward, for verification.
# ----------------------------------------------------------------------------
def reference_loss(embedding, pos_mask, neg_mask, temperature: float):
    b = embedding.shape[0]
    sim = jnp.exp(embedding @ embedding.T / temperature)
    pos = jnp.sum(sim * pos_mask, axis=1)[: b // 2]
    neg = jnp.sum(sim * neg_mask, axis=1)[: b // 2]
    return -jnp.mean(jnp.log(pos / (pos + neg)))


if __name__ == "__main__":
    # buffer_params: world_size=1, effective_batch_size=8, embedding_dim=32
    # => local batch = effective_batch_size * num_neg = 16
    effective_batch_size = 8
    world_size = 1
    rank = 0
    embedding_dim = 32
    temperature = 0.1

    b_local = (effective_batch_size // world_size) * NUM_NEG  # 16

    key = jax.random.PRNGKey(0)
    emb = jax.random.normal(key, (b_local, embedding_dim), dtype=jnp.float32)
    emb = emb / jnp.linalg.norm(emb, axis=1, keepdims=True)   # SimCLR-style unit norm

    # The structural (mask-free) decomposition must reproduce the module's masks exactly.
    pos_mask_np, neg_mask_np = precompute_pos_neg_mask(effective_batch_size, world_size, rank)
    pos_struct, neg_struct = masks_from_structure(effective_batch_size, world_size, rank)
    assert np.array_equal(pos_mask_np, pos_struct)
    assert np.array_equal(neg_mask_np, neg_struct)

    ref = jax.block_until_ready(
        reference_loss(emb, jnp.asarray(pos_mask_np), jnp.asarray(neg_mask_np), temperature)
    )

    # Exact path (f32 MXU operands): matches the PyTorch forward to fp32 rounding.
    crit_f32 = make_neg_mining_info_nce_criterion(
        effective_batch_size, embedding_dim, temperature, world_size, rank,
        compute_dtype=jnp.float32)
    loss_f32 = jax.block_until_ready(crit_f32(emb))
    assert np.allclose(np.asarray(loss_f32), np.asarray(ref), rtol=1e-5, atol=1e-5), (loss_f32, ref)

    # Fast path (default bf16 MXU operands): ~1e-3 relative precision budget.
    crit_bf16 = make_neg_mining_info_nce_criterion(
        effective_batch_size, embedding_dim, temperature, world_size, rank,
        compute_dtype=jnp.bfloat16)
    loss_bf16 = jax.block_until_ready(crit_bf16(emb))
    assert np.allclose(np.asarray(loss_bf16), np.asarray(ref), rtol=5e-2, atol=5e-2), (loss_bf16, ref)

    print("KERNEL_OK")
</pallas_src>

<mosaic_0001>
module attributes {stable_mosaic.version = 11 : i64} {
  func.func @_neg_mining_infonce_kernel(%arg0: i32, %arg1: i32, %arg2: memref<8x32xf32, #tpu.memory_space<vmem>>, %arg3: memref<32x128xf32, #tpu.memory_space<vmem>>, %arg4: memref<1x128xf32, #tpu.memory_space<vmem>>, %arg5: memref<8x128xf32, #tpu.memory_space<vmem>>, %arg6: memref<8x128xf32, #tpu.memory_space<vmem>>, %arg7: memref<8x128xf32, #tpu.memory_space<vmem>>) attributes {dimension_semantics = [#tpu.dimension_semantics<parallel>, #tpu.dimension_semantics<arbitrary>], iteration_bounds = array<i64: 1, 1>, scalar_prefetch = 0 : i64, scratch_operands = 2 : i64, tpu.core_type = #tpu.core_type<tc>, window_params = [{transform_indices = @transform_0, window_bounds = array<i64: 8, 32>}, {transform_indices = @transform_1, window_bounds = array<i64: 32, 128>}, {transform_indices = @transform_2, window_bounds = array<i64: 1, 128>}, {transform_indices = @transform_3, window_bounds = array<i64: 8, 128>}]} {
    %c0_i32 = arith.constant 0 : i32
    %0 = arith.cmpi eq, %arg1, %c0_i32 : i32
    %1 = arith.extui %0 : i1 to i32
    %c0_i32_0 = arith.constant 0 : i32
    %2 = arith.cmpi ne, %1, %c0_i32_0 : i32
    scf.if %2 {
      %cst_24 = arith.constant 0.000000e+00 : f32
      %55 = vector.broadcast %cst_24 : f32 to vector<8x128xf32>
      %c0_25 = arith.constant 0 : index
      %c0_26 = arith.constant 0 : index
      %56 = vector.load %arg6[%c0_25, %c0_26] : memref<8x128xf32, #tpu.memory_space<vmem>>, vector<8x128xf32>
      tpu.vector_store %arg6[%c0_25, %c0_26], %55 {strides = array<i32>} : memref<8x128xf32, #tpu.memory_space<vmem>>, vector<8x128xf32>,
      %cst_27 = arith.constant 0.000000e+00 : f32
      %57 = vector.broadcast %cst_27 : f32 to vector<8x128xf32>
      %c0_28 = arith.constant 0 : index
      %c0_29 = arith.constant 0 : index
      %58 = vector.load %arg7[%c0_28, %c0_29] : memref<8x128xf32, #tpu.memory_space<vmem>>, vector<8x128xf32>
      tpu.vector_store %arg7[%c0_28, %c0_29], %57 {strides = array<i32>} : memref<8x128xf32, #tpu.memory_space<vmem>>, vector<8x128xf32>,
    } else {
    }
    %c0 = arith.constant 0 : index
    %c0_1 = arith.constant 0 : index
    %3 = vector.load %arg2[%c0, %c0_1] : memref<8x32xf32, #tpu.memory_space<vmem>>, vector<8x32xf32>
    %c0_2 = arith.constant 0 : index
    %c0_3 = arith.constant 0 : index
    %4 = vector.load %arg3[%c0_2, %c0_3] : memref<32x128xf32, #tpu.memory_space<vmem>>, vector<32x128xf32>
    %cst = arith.constant dense<0.000000e+00> : vector<8x128xf32>
    %5 = tpu.matmul %3, %4, %cst {dimension_numbers = #tpu.dot_dimension_numbers<[1], [0], [0], [1], [0, 0, 1, 1], [], []>} : vector<8x32xf32>, vector<32x128xf32>, vector<8x128xf32> -> vector<8x128xf32>
    %6 = math.exp %5 : vector<8x128xf32>
    %c8_i32 = arith.constant 8 : i32
    %7 = arith.muli %arg0, %c8_i32 : i32
    %8 = tpu.iota {dimensions = array<i32: 0>} : vector<8x1xi32>
    %9 = vector.broadcast %7 : i32 to vector<8x1xi32>
    %10 = arith.addi %9, %8 : vector<8x1xi32>
    %c4_i32 = arith.constant 4 : i32
    %11 = vector.broadcast %c4_i32 : i32 to vector<8x1xi32>
    %12 = arith.cmpi sge, %10, %11 : vector<8x1xi32>
    %c4_i32_4 = arith.constant 4 : i32
    %13 = vector.broadcast %c4_i32_4 : i32 to vector<8x1xi32>
    %14 = arith.subi %10, %13 : vector<8x1xi32>
    %15 = arith.select %12, %14, %10 : vector<8x1xi1>, vector<8x1xi32>
    %c4_i32_5 = arith.constant 4 : i32
    %16 = vector.broadcast %c4_i32_5 : i32 to vector<8x1xi32>
    %17 = arith.subi %10, %16 : vector<8x1xi32>
    %c4_i32_6 = arith.constant 4 : i32
    %18 = vector.broadcast %c4_i32_6 : i32 to vector<8x1xi32>
    %19 = arith.addi %10, %18 : vector<8x1xi32>
    %20 = arith.select %12, %17, %19 : vector<8x1xi1>, vector<8x1xi32>
    %c0_i32_7 = arith.constant 0 : i32
    %21 = vector.broadcast %c0_i32_7 : i32 to vector<8x1xi32>
    %22 = arith.addi %21, %20 : vector<8x1xi32>
    %c8_i32_8 = arith.constant 8 : i32
    %23 = vector.broadcast %c8_i32_8 : i32 to vector<8x1xi32>
    %24 = arith.addi %23, %15 : vector<8x1xi32>
    %c4_i32_9 = arith.constant 4 : i32
    %25 = vector.broadcast %c4_i32_9 : i32 to vector<8x1xi32>
    %26 = arith.addi %24, %25 : vector<8x1xi32>
    %c128_i32 = arith.constant 128 : i32
    %27 = arith.muli %arg1, %c128_i32 : i32
    %28 = tpu.iota {dimensions = array<i32: 1>} : vector<8x128xi32>
    %29 = vector.broadcast %27 : i32 to vector<8x128xi32>
    %30 = arith.addi %29, %28 : vector<8x128xi32>
    %31 = vector.broadcast %22 : vector<8x1xi32> to vector<8x128xi32>
    %32 = arith.cmpi eq, %30, %31 : vector<8x128xi32>
    %cst_10 = arith.constant 0.000000e+00 : f32
    %33 = vector.broadcast %cst_10 : f32 to vector<8x128xf32>
    %34 = arith.select %32, %6, %33 : vector<8x128xi1>, vector<8x128xf32>
    %c0_11 = arith.constant 0 : index
    %c0_12 = arith.constant 0 : index
    %35 = vector.load %arg4[%c0_11, %c0_12] : memref<1x128xf32, #tpu.memory_space<vmem>>, vector<1x128xf32>
    %36 = vector.broadcast %35 : vector<1x128xf32> to vector<8x128xf32>
    %37 = arith.mulf %6, %36 : vector<8x128xf32>
    %38 = vector.broadcast %24 : vector<8x1xi32> to vector<8x128xi32>
    %39 = arith.cmpi eq, %30, %38 : vector<8x128xi32>
    %40 = vector.broadcast %26 : vector<8x1xi32> to vector<8x128xi32>
    %41 = arith.cmpi eq, %30, %40 : vector<8x128xi32>
    %42 = arith.ori %39, %41 : vector<8x128xi1>
    %cst_13 = arith.constant 0.000000e+00 : f32
    %43 = vector.broadcast %cst_13 : f32 to vector<8x128xf32>
    %44 = arith.select %42, %6, %43 : vector<8x128xi1>, vector<8x128xf32>
    %45 = arith.subf %37, %44 : vector<8x128xf32>
    %c0_14 = arith.constant 0 : index
    %c0_15 = arith.constant 0 : index
    %46 = vector.load %arg6[%c0_14, %c0_15] : memref<8x128xf32, #tpu.memory_space<vmem>>, vector<8x128xf32>
    %47 = arith.addf %46, %34 : vector<8x128xf32>
    %c0_16 = arith.constant 0 : index
    %c0_17 = arith.constant 0 : index
    %48 = vector.load %arg6[%c0_16, %c0_17] : memref<8x128xf32, #tpu.memory_space<vmem>>, vector<8x128xf32>
    tpu.vector_store %arg6[%c0_16, %c0_17], %47 {strides = array<i32>} : memref<8x128xf32, #tpu.memory_space<vmem>>, vector<8x128xf32>,
    %c0_18 = arith.constant 0 : index
    %c0_19 = arith.constant 0 : index
    %49 = vector.load %arg7[%c0_18, %c0_19] : memref<8x128xf32, #tpu.memory_space<vmem>>, vector<8x128xf32>
    %50 = arith.addf %49, %45 : vector<8x128xf32>
    %c0_20 = arith.constant 0 : index
    %c0_21 = arith.constant 0 : index
    %51 = vector.load %arg7[%c0_20, %c0_21] : memref<8x128xf32, #tpu.memory_space<vmem>>, vector<8x128xf32>
    tpu.vector_store %arg7[%c0_20, %c0_21], %50 {strides = array<i32>} : memref<8x128xf32, #tpu.memory_space<vmem>>, vector<8x128xf32>,
    %c0_i32_22 = arith.constant 0 : i32
    %52 = arith.cmpi eq, %arg1, %c0_i32_22 : i32
    %53 = arith.extui %52 : i1 to i32
    %c0_i32_23 = arith.constant 0 : i32
    %54 = arith.cmpi ne, %53, %c0_i32_23 : i32
    scf.if %54 {
      %c0_24 = arith.constant 0 : index
      %c0_25 = arith.constant 0 : index
      %55 = vector.load %arg6[%c0_24, %c0_25] : memref<8x128xf32, #tpu.memory_space<vmem>>, vector<8x128xf32>
      %cst_26 = arith.constant dense<0.000000e+00> : vector<8xf32>
      %56 = vector.multi_reduction <add>, %55, %cst_26 [1] : vector<8x128xf32> to vector<8xf32>
      %57 = vector.shape_cast %56 : vector<8xf32> to vector<8x1xf32>
      %c0_27 = arith.constant 0 : index
      %c0_28 = arith.constant 0 : index
      %58 = vector.load %arg7[%c0_27, %c0_28] : memref<8x128xf32, #tpu.memory_space<vmem>>, vector<8x128xf32>
      %cst_29 = arith.constant dense<0.000000e+00> : vector<8xf32>
      %59 = vector.multi_reduction <add>, %58, %cst_29 [1] : vector<8x128xf32> to vector<8xf32>
      %60 = vector.shape_cast %59 : vector<8xf32> to vector<8x1xf32>
      %61 = arith.addf %57, %60 : vector<8x1xf32>
      %62 = arith.divf %57, %61 : vector<8x1xf32>
      %63 = math.log %62 : vector<8x1xf32>
      %64 = vector.shape_cast %63 : vector<8x1xf32> to vector<8x1xf32>
      %65 = vector.broadcast %64 : vector<8x1xf32> to vector<8x128xf32>
      %c0_30 = arith.constant 0 : index
      %c0_31 = arith.constant 0 : index
      %66 = vector.load %arg5[%c0_30, %c0_31] : memref<8x128xf32, #tpu.memory_space<vmem>>, vector<8x128xf32>
      tpu.vector_store %arg5[%c0_30, %c0_31], %65 {strides = array<i32>} : memref<8x128xf32, #tpu.memory_space<vmem>>, vector<8x128xf32>,
    } else {
    }
    return
  }
  func.func @transform_0(%arg0: i32, %arg1: i32) -> (i32, i32) {
    %c0_i32 = arith.constant 0 : i32
    %c0_i32_0 = arith.constant 0 : i32
    return %arg0, %c0_i32 : i32, i32
  }
  func.func @transform_1(%arg0: i32, %arg1: i32) -> (i32, i32) {
    %c0_i32 = arith.constant 0 : i32
    %c0_i32_0 = arith.constant 0 : i32
    return %c0_i32, %arg1 : i32, i32
  }
  func.func @transform_2(%arg0: i32, %arg1: i32) -> (i32, i32) {
    %c0_i32 = arith.constant 0 : i32
    %c0_i32_0 = arith.constant 0 : i32
    return %c0_i32, %arg1 : i32, i32
  }
  func.func @transform_3(%arg0: i32, %arg1: i32) -> (i32, i32) {
    %c0_i32 = arith.constant 0 : i32
    %c0_i32_0 = arith.constant 0 : i32
    return %arg0, %c0_i32 : i32, i32
  }
}

</mosaic_0001>

<bundles_post_ra>
// kernel: tpu_custom_call.1
= control target key start
LH: loop header
LB: loop body
LE: loop exit
PB: predicated region body
PF: predicated region fallthrough
CT: control target
= control target key end

     0   :  { %8 = vsyncpa [#allocation5], 0  ;;  %s292_s0 = inlined_call_operand.hbm [shape: f32[8,32], index: 0, kind: input, shape index: {}]   ;;  %s293_s1 = inlined_call_operand.hbm [shape: f32[32,128], index: 1, kind: input, shape index: {}]   ;;  %s294_s2 = inlined_call_operand.vmem [shape: f32[1,128], index: 2, kind: input, shape index: {}]   ;;  %s295_s3 = inlined_call_operand.hbm [shape: f32[8,128], index: 3, kind: output, shape index: {}]  }
   0x1   :  { %9 = vsyncpa [#allocation8], 0 }
   0x2   :  { %10 = vsyncpa [#allocation6], 0  ;;  %s16_s14 = sshll.u32 %s292_s0, 4  ;;  %s255_s15 = smov [#allocation4]   ;;  %s17_s14 = int_to_ptr.hbm [resolvable:$true] %s16_s14 }
   0x3   :  { %s18_s16 = sshll.u32 %s255_s15, 4  ;;  %s26_s19 = sshll.u32 %s293_s1, 4  ;;  %s19_s16 = int_to_ptr.vmem [resolvable:$true] %s18_s16  ;;  %s27_s19 = int_to_ptr.hbm [resolvable:$true] %s26_s19 }
   0x4   :  { %21 = dma.hbm_to_vmem [thread:$0]  %s17_s14, 128, %s19_s16, [#allocation5]  }
   0x5   :  { %s256_s20 = smov [#allocation7]   ;;  %s257_s22 = smov 128  }
   0x6   :  { %s28_s21 = sshll.u32 %s256_s20, 4  ;;  %s258_s23 = smov 8   ;;  %s29_s21 = int_to_ptr.vmem [resolvable:$true] %s28_s21 }
   0x7   :  { %34 = dma.hbm_to_vmem [thread:$0]  %s27_s19, 512, %s29_s21, [#allocation8], %s257_s22, %s257_s22, %s258_s23  }
   0x8   :  { %249 = dma.done.wait [#allocation5], 128  }
   0x9   :  { %250 = vsyncadd [#allocation5], 4294967168 }
   0xa   :  { %251 = dma.done.wait [#allocation8], 512  }
   0xb   :  { %252 = vsyncadd [#allocation8], 4294966784  ;;  %v55_v0 = vld [vmem:[#allocation7 + $0x18] sm:$0xff]  ;;  %v54_v1 = vld [vmem:[#allocation7 + $0x10] sm:$0xff]  ;;  %vm56_vm0 = vcmask 261120   ;;  %v83_v5 = vlaneseq  ;;  %s152_s27 = sshll.u32 %s295_s3, 4  ;;  %s153_s27 = int_to_ptr.hbm [resolvable:$true] %s152_s27 }
   0xc   :  { %72 = vmatpush.msra.mxu0 %v55_v0  ;;  %v53_v2 = vld [vmem:[#allocation7 + $0x8] sm:$0xff]  ;;  %v52_v3 = vld [vmem:[#allocation7] sm:$0xff]  ;;  %v51_v4 = vld [vmem:[#allocation4] sm:$0xff] }
   0xd   :  { %v84_v6 = vshrl.u32 %v83_v5, 7  ;;  %v96_v13 = vand.u32 127, %v83_v5  ;;  %v170_v17 = vld [vmem:[%s294_s2] ss:$0 sm:$0xff]  ;;  %s259_s2 = smov [#allocation9]  }
   0xe   :  { %73 = vmatpush.msra.mxu0 %v54_v1  ;;  %s150_s24 = sshll.u32 %s259_s2, 4  ;;  %s151_s24 = int_to_ptr.vmem [resolvable:$true] %s150_s24 }
   0xf   :  { %v164_v7 = vadd.s32 4294967292, %v84_v6  ;;  %vm87_vm1 = vcmp.ge.s32.totalorder %v84_v6, 4  ;;  %v90_v10 = vadd.s32 4, %v84_v6 }
  0x10   :  { %74 = vmatpush.msra.mxu0 %v53_v2 }
  0x11   :  { %v89_v8 = vsel %vm87_vm1, %v164_v7, %v84_v6  ;;  %v91_v14 = vsel %vm87_vm1, %v164_v7, %v90_v10 }
  0x12   :  { %75 = vmatpush.msra.mxu0 %v52_v3  ;;  %v92_v11 = vadd.s32 8, %v89_v8  ;;  %vm99_vm2 = vcmp.eq.s32.totalorder %v96_v13, %v91_v14 }
  0x13   :  { %163 = vmatmul.msk.f32.vlgmr.msra.gmra.mxu0 %vm56_vm0, %v51_v4 }
  0x14   :  { %v93_v15 = vadd.s32 4, %v92_v11  ;;  %vm106_vm3 = vcmp.eq.s32.totalorder %v96_v13, %v92_v11 }
  0x16   :  { %vm107_vm4 = vcmp.eq.s32.totalorder %v96_v13, %v93_v15 }
  0x17   :  { %vm108_vm5 = vmor %vm106_vm3, %vm107_vm4 }
  0x90   :  { %v77_v9 = vpop.f32.mrf.mxu0 }
  0x91   :  { %v80_v12 = vmul.f32 1.442695, %v77_v9 }
  0x93   :  { %171 = vpow2.f32 %v80_v12 }
  0x99   :  { %v172_v16 = vpop.eup %171 }
  0x9a   :  { %v100_v18 = vsel %vm99_vm2, %v172_v16, 0.0  ;;  %v105_v19 = vmul.f32 %v172_v16, %v170_v17  ;;  %v109_v20 = vsel %vm108_vm5, %v172_v16, 0.0 }
  0x9b   :  { %121 = vadd.xlane.f32.xlu0 %v100_v18 }
  0x9c   :  { %v110_v21 = vsub.f32 %v105_v19, %v109_v20 }
  0xa3   :  { %124 = vadd.xlane.f32.xlu0 %v110_v21 }
 0x10e   :  { %v122_v22 = vpop.xlane.xlu0 %121 }
 0x116   :  { %v125_v23 = vpop.xlane.xlu0 %124 }
 0x117   :  { %v126_v24 = vadd.f32 %v125_v23, %v122_v22 }
 0x119   :  { %173 = vrcp.f32 %v126_v24  ;;  %v138_v28 = vand.u32 2147483648, %v126_v24  ;;  %v136_v30 = vand.u32 2147483647, %v126_v24  ;;  %vm132_vm7 = vweird.f32 %v126_v24 }
 0x11b   :  { %v139_v32 = vor.u32 1.1754944e-38, %v138_v28  ;;  %vm137_vm9 = vcmp.eq.f32.partialorder %v136_v30, 8.507059e+37 }
 0x11f   :  { %v174_v25 = vpop.eup %173 }
 0x120   :  { %v128_v26 = vmul.f32 %v174_v25, %v126_v24  ;;  %vm133_vm6 = vweird.f32 %v174_v25 }
 0x121   :  { %vm134_vm8 = vmor %vm132_vm7, %vm133_vm6 }
 0x122   :  { %v129_v27 = vsub.f32 1.0, %v128_v26 }
 0x124   :  { %v130_v29 = vmul.f32 %v174_v25, %v129_v27 }
 0x126   :  { %v131_v31 = vadd.f32 %v174_v25, %v130_v29 }
 0x128   :  { %v135_v33 = vsel %vm134_vm8, %v174_v25, %v131_v31 }
 0x129   :  { %v140_v34 = vsel %vm137_vm9, %v139_v32, %v135_v33 }
 0x12a   :  { %v141_v35 = vmul.f32 %v140_v34, %v122_v22 }
 0x12c   :  { %175 = vlog2.f32 %v141_v35 }
 0x132   :  { %v176_v36 = vpop.eup %175 }
 0x133   :  { %v143_v37 = vmul.f32 0.6931472, %v176_v36 }
 0x135   :  { %144 = vst [vmem:[#allocation9] sm:$0xff] %v143_v37 }
 0x136   :  { %155 = dma.vmem_to_hbm [thread:$0]  %s151_s24, 128, %s153_s27, [#allocation6]  }
 0x137   :  { %253 = dma.done.wait [#allocation6], 128  }
 0x138   :  { %254 = vsyncadd [#allocation6], 4294967168 }
 0x139   :  { %160 = vsyncpa [#allocation5], 1 }
 0x13a   :  { %161 = vsyncpa [#allocation8], 1 }
 0x13b   :  { %162 = vsyncpa [#allocation6], 1 }

</bundles_post_ra>
